<compile_context>
chip_gen: v6e
topology: v6e:2x2x1
jax: 0.10.0
libtpu: 0.0.40
codegen_flags: <defaults>
</compile_context>

<pallas_src>
import functools

import jax
import jax.numpy as jnp
from jax.experimental import pallas as pl
from jax.experimental.pallas import tpu as pltpu

_EPS = 1e-6  # F.pairwise_distance default eps (added to the difference)


def _round_up(x, m):
    return ((x + m - 1) // m) * m


def _default_tile_n(n, d, itemsize, sub_mult):
    """Largest batch tile that keeps live double-buffered VMEM in budget."""
    try:
        vmem_bytes = pltpu.get_tpu_info().vmem_capacity_bytes
    except Exception:  # pragma: no cover - info query unavailable
        vmem_bytes = 64 * 1024 * 1024  # v7x-conservative fallback
    if vmem_bytes >= 128 * 1024 * 1024:
        budget = 32 * 1024 * 1024      # v5e / v6e: 128 MiB VMEM -> big tiles
    else:
        budget = 14 * 1024 * 1024      # v7x: 64 MiB VMEM per TensorCore

    d_pad = _round_up(d, 128)          # lane padding of the input rows in VMEM
    # Per-row live VMEM:
    #   2 inputs x 2 pipeline buffers x d_pad x itemsize
    # + label  (tile_n,1) f32 -> (.,128)-padded: 512 B/row x 2 buffers
    # + output (tile_n,1) f32 -> (.,128)-padded: 512 B/row x 2 buffers
    per_row = 4 * d_pad * itemsize + 4 * 512
    tile = max(budget // per_row, 1)
    tile = max((tile // sub_mult) * sub_mult, sub_mult)

    n_cap = _round_up(n, sub_mult)
    # Keep >= 2 grid steps when the batch allows it so the "parallel" batch
    # axis can actually be sharded across both TensorCores on v7x.
    if n_cap >= 2 * sub_mult:
        tile = min(tile, _round_up((n_cap + 1) // 2, sub_mult))
    tile = min(tile, n_cap)
    return tile


def _hinge_loss_kernel(x0_ref, x1_ref, lbl_ref, out_ref, *, threshold, margin,
                       n_rows, tile_n):
    # Hot path: per-row L2 distance + hinge terms.  No carried accumulator;
    # each grid step is independent, so the batch axis is "parallel".
    i = pl.program_id(0)
    diff = x0_ref[...].astype(jnp.float32) - x1_ref[...].astype(jnp.float32) + _EPS
    dist = jnp.sqrt(jnp.sum(diff * diff, axis=-1, keepdims=True))  # (tile_n, 1)

    similar = jnp.maximum(dist - threshold, 0.0)
    dissimilar = jnp.maximum(margin - dist, 0.0)

    lbl = lbl_ref[...].astype(jnp.float32)                          # (tile_n, 1)
    term = (1.0 - lbl) * similar * similar + lbl * dissimilar * dissimilar

    # Mask tail rows of the (possibly partial) last tile: their inputs are
    # uninitialized VMEM (can be NaN/Inf), so select-mask before emitting.
    row = i * tile_n + jax.lax.broadcasted_iota(jnp.int32, (tile_n, 1), 0)
    out_ref[...] = jnp.where(row < n_rows, term, 0.0)


def contrastive_threshold_hinge_loss(out_vec_t0, out_vec_t1, label,
                                     hingethresh=0.0, margin=2.0, tile_n=None):
    """Pallas TPU implementation of ConstractiveThresholdHingeLoss.forward."""
    N, D = out_vec_t0.shape
    assert out_vec_t1.shape == (N, D)

    itemsize = jnp.dtype(out_vec_t0.dtype).itemsize
    sub_mult = max(8, 32 // itemsize)  # 8 for f32, 16 for bf16, 32 for int8/fp8

    if tile_n is None:
        tile_n = _default_tile_n(N, D, itemsize, sub_mult)
    assert tile_n > 0 and tile_n % sub_mult == 0, (
        f"tile_n={tile_n} must be a positive multiple of {sub_mult} for "
        f"dtype {out_vec_t0.dtype}")

    # No padding of the (N, D) input streams: the grid uses a partial last
    # block and the kernel masks tail rows against N.
    num_tiles = pl.cdiv(N, tile_n)
    label_2d = jnp.reshape(label, (N, 1)).astype(jnp.float32)

    kernel = functools.partial(_hinge_loss_kernel,
                               threshold=float(hingethresh),
                               margin=float(margin),
                               n_rows=N, tile_n=tile_n)

    # VMEM limit from the actual double-buffered footprint + headroom.
    d_pad = _round_up(D, 128)
    live_bytes = 4 * tile_n * d_pad * itemsize + 4 * tile_n * 512
    vmem_limit = max(live_bytes + 4 * 1024 * 1024, 32 * 1024 * 1024)

    per_row = pl.pallas_call(
        kernel,
        out_shape=jax.ShapeDtypeStruct((N, 1), jnp.float32),
        grid_spec=pltpu.PrefetchScalarGridSpec(
            num_scalar_prefetch=0,
            grid=(num_tiles,),
            in_specs=[
                pl.BlockSpec((tile_n, D), lambda i: (i, 0)),
                pl.BlockSpec((tile_n, D), lambda i: (i, 0)),
                pl.BlockSpec((tile_n, 1), lambda i: (i, 0)),
            ],
            out_specs=pl.BlockSpec((tile_n, 1), lambda i: (i, 0)),
        ),
        compiler_params=pltpu.CompilerParams(
            dimension_semantics=("parallel",),
            vmem_limit_bytes=int(vmem_limit)),
    )(out_vec_t0, out_vec_t1, label_2d)

    # Final reduction over the N per-row hinge terms, in float32.
    return jnp.sum(per_row[:, 0])


def _reference_loss(x0, x1, label, hingethresh=0.0, margin=2.0):
    """Plain-JAX reference mirroring the PyTorch module (for verification)."""
    diff = x0.astype(jnp.float32) - x1.astype(jnp.float32) + _EPS
    dist = jnp.sqrt(jnp.sum(diff * diff, axis=-1))
    similar = jnp.maximum(dist - hingethresh, 0.0)
    dissimilar = jnp.maximum(margin - dist, 0.0)
    lbl = jnp.reshape(label, (-1,)).astype(jnp.float32)
    return jnp.sum((1.0 - lbl) * similar ** 2 + lbl * dissimilar ** 2)


if __name__ == "__main__":
    key = jax.random.PRNGKey(0)
    k0, k1, k2, k3, k4, k5, k6, k7, k8 = jax.random.split(key, 9)

    # Case 1: small batch of embedding vectors, default (auto) tile size.
    N, D = 8, 32
    x0 = jax.random.normal(k0, (N, D), dtype=jnp.float32)
    x1 = jax.random.normal(k1, (N, D), dtype=jnp.float32)
    label = (jax.random.uniform(k2, (N,)) > 0.5).astype(jnp.float32)

    loss = contrastive_threshold_hinge_loss(x0, x1, label,
                                            hingethresh=0.0, margin=2.0)
    loss = jax.block_until_ready(loss)
    ref = _reference_loss(x0, x1, label, hingethresh=0.0, margin=2.0)
    assert jnp.allclose(loss, ref, rtol=1e-5, atol=1e-4), (loss, ref)

    # Case 2: batch not a multiple of the tile (exercises the partial last
    # block + in-kernel tail mask) with non-default threshold/margin.
    N2, D2 = 20, 32
    y0 = jax.random.normal(k3, (N2, D2), dtype=jnp.float32)
    y1 = jax.random.normal(k4, (N2, D2), dtype=jnp.float32)
    label2 = (jax.random.uniform(k5, (N2,)) > 0.5).astype(jnp.float32)

    loss2 = contrastive_threshold_hinge_loss(y0, y1, label2,
                                             hingethresh=0.5, margin=1.5,
                                             tile_n=8)
    loss2 = jax.block_until_ready(loss2)
    ref2 = _reference_loss(y0, y1, label2, hingethresh=0.5, margin=1.5)
    assert jnp.allclose(loss2, ref2, rtol=1e-5, atol=1e-4), (loss2, ref2)

    # Case 3: auto tile with a batch that forces >=2 grid steps and a ragged
    # tail (exercises the >=2-tile cap + masking on the auto path).
    N3, D3 = 37, 96
    z0 = jax.random.normal(k6, (N3, D3), dtype=jnp.float32)
    z1 = jax.random.normal(k7, (N3, D3), dtype=jnp.float32)
    label3 = (jax.random.uniform(k8, (N3,)) > 0.5).astype(jnp.float32)

    loss3 = contrastive_threshold_hinge_loss(z0, z1, label3,
                                             hingethresh=0.2, margin=2.0)
    loss3 = jax.block_until_ready(loss3)
    ref3 = _reference_loss(z0, z1, label3, hingethresh=0.2, margin=2.0)
    assert jnp.allclose(loss3, ref3, rtol=1e-5, atol=1e-4), (loss3, ref3)

    print("KERNEL_OK")
</pallas_src>

<mosaic_0001>
module attributes {stable_mosaic.version = 11 : i64} {
  func.func @_hinge_loss_kernel(%arg0: i32, %arg1: memref<8x32xf32, #tpu.memory_space<vmem>>, %arg2: memref<8x32xf32, #tpu.memory_space<vmem>>, %arg3: memref<8x1xf32, #tpu.memory_space<vmem>>, %arg4: memref<8x1xf32, #tpu.memory_space<vmem>>) attributes {dimension_semantics = [#tpu.dimension_semantics<parallel>], iteration_bounds = array<i64: 1>, scalar_prefetch = 0 : i64, scratch_operands = 0 : i64, tpu.core_type = #tpu.core_type<tc>, window_params = [{transform_indices = @transform_0, window_bounds = array<i64: 8, 32>}, {transform_indices = @transform_1, window_bounds = array<i64: 8, 32>}, {transform_indices = @transform_2, window_bounds = array<i64: 8, 1>}, {transform_indices = @transform_3, window_bounds = array<i64: 8, 1>}]} {
    %c0 = arith.constant 0 : index
    %c0_0 = arith.constant 0 : index
    %0 = vector.load %arg1[%c0, %c0_0] : memref<8x32xf32, #tpu.memory_space<vmem>>, vector<8x32xf32>
    %c0_1 = arith.constant 0 : index
    %c0_2 = arith.constant 0 : index
    %1 = vector.load %arg2[%c0_1, %c0_2] : memref<8x32xf32, #tpu.memory_space<vmem>>, vector<8x32xf32>
    %2 = arith.subf %0, %1 : vector<8x32xf32>
    %cst = arith.constant 9.99999997E-7 : f32
    %3 = vector.broadcast %cst : f32 to vector<8x32xf32>
    %4 = arith.addf %2, %3 : vector<8x32xf32>
    %5 = arith.mulf %4, %4 : vector<8x32xf32>
    %cst_3 = arith.constant dense<0.000000e+00> : vector<8xf32>
    %6 = vector.multi_reduction <add>, %5, %cst_3 [1] : vector<8x32xf32> to vector<8xf32>
    %7 = vector.shape_cast %6 : vector<8xf32> to vector<8x1xf32>
    %8 = math.sqrt %7 : vector<8x1xf32>
    %cst_4 = arith.constant 0.000000e+00 : f32
    %9 = vector.broadcast %cst_4 : f32 to vector<8x1xf32>
    %10 = arith.subf %8, %9 : vector<8x1xf32>
    %cst_5 = arith.constant 0.000000e+00 : f32
    %11 = vector.broadcast %cst_5 : f32 to vector<8x1xf32>
    %12 = arith.maximumf %10, %11 : vector<8x1xf32>
    %cst_6 = arith.constant 2.000000e+00 : f32
    %13 = vector.broadcast %cst_6 : f32 to vector<8x1xf32>
    %14 = arith.subf %13, %8 : vector<8x1xf32>
    %cst_7 = arith.constant 0.000000e+00 : f32
    %15 = vector.broadcast %cst_7 : f32 to vector<8x1xf32>
    %16 = arith.maximumf %14, %15 : vector<8x1xf32>
    %c0_8 = arith.constant 0 : index
    %c0_9 = arith.constant 0 : index
    %17 = vector.load %arg3[%c0_8, %c0_9] : memref<8x1xf32, #tpu.memory_space<vmem>>, vector<8x1xf32>
    %cst_10 = arith.constant 1.000000e+00 : f32
    %18 = vector.broadcast %cst_10 : f32 to vector<8x1xf32>
    %19 = arith.subf %18, %17 : vector<8x1xf32>
    %20 = arith.mulf %19, %12 : vector<8x1xf32>
    %21 = arith.mulf %20, %12 : vector<8x1xf32>
    %22 = arith.mulf %17, %16 : vector<8x1xf32>
    %23 = arith.mulf %22, %16 : vector<8x1xf32>
    %24 = arith.addf %21, %23 : vector<8x1xf32>
    %c8_i32 = arith.constant 8 : i32
    %25 = arith.muli %arg0, %c8_i32 : i32
    %26 = tpu.iota {dimensions = array<i32: 0>} : vector<8x1xi32>
    %27 = vector.broadcast %25 : i32 to vector<8x1xi32>
    %28 = arith.addi %27, %26 : vector<8x1xi32>
    %c8_i32_11 = arith.constant 8 : i32
    %29 = vector.broadcast %c8_i32_11 : i32 to vector<8x1xi32>
    %30 = arith.cmpi slt, %28, %29 : vector<8x1xi32>
    %cst_12 = arith.constant 0.000000e+00 : f32
    %31 = vector.broadcast %cst_12 : f32 to vector<8x1xf32>
    %32 = arith.select %30, %24, %31 : vector<8x1xi1>, vector<8x1xf32>
    %c0_13 = arith.constant 0 : index
    %c0_14 = arith.constant 0 : index
    %33 = vector.load %arg4[%c0_13, %c0_14] : memref<8x1xf32, #tpu.memory_space<vmem>>, vector<8x1xf32>
    tpu.vector_store %arg4[%c0_13, %c0_14], %32 {strides = array<i32>} : memref<8x1xf32, #tpu.memory_space<vmem>>, vector<8x1xf32>,
    return
  }
  func.func @transform_0(%arg0: i32) -> (i32, i32) {
    %c0_i32 = arith.constant 0 : i32
    %c0_i32_0 = arith.constant 0 : i32
    return %arg0, %c0_i32 : i32, i32
  }
  func.func @transform_1(%arg0: i32) -> (i32, i32) {
    %c0_i32 = arith.constant 0 : i32
    %c0_i32_0 = arith.constant 0 : i32
    return %arg0, %c0_i32 : i32, i32
  }
  func.func @transform_2(%arg0: i32) -> (i32, i32) {
    %c0_i32 = arith.constant 0 : i32
    %c0_i32_0 = arith.constant 0 : i32
    return %arg0, %c0_i32 : i32, i32
  }
  func.func @transform_3(%arg0: i32) -> (i32, i32) {
    %c0_i32 = arith.constant 0 : i32
    %c0_i32_0 = arith.constant 0 : i32
    return %arg0, %c0_i32 : i32, i32
  }
}

</mosaic_0001>

<bundles_post_ra>
// kernel: tpu_custom_call.1
= control target key start
LH: loop header
LB: loop body
LE: loop exit
PB: predicated region body
PF: predicated region fallthrough
CT: control target
= control target key end

     0   :  { %8 = vsyncpa [#allocation3], 0  ;;  %s91_s12 = smov [#allocation2]   ;;  %s124_s0 = inlined_call_operand.vmem [shape: f32[8,32], index: 0, kind: input, shape index: {}]   ;;  %s125_s1 = inlined_call_operand.hbm [shape: f32[8,32], index: 1, kind: input, shape index: {}]   ;;  %s126_s2 = inlined_call_operand.vmem [shape: f32[8,1], index: 2, kind: input, shape index: {}]   ;;  %s127_s3 = inlined_call_operand.vmem [shape: f32[8,1], index: 3, kind: output, shape index: {}]  }
   0x1   :  { %s17_s13 = sshll.u32 %s91_s12, 4  ;;  %s18_s13 = int_to_ptr.vmem [resolvable:$true] %s17_s13 }
   0x2   :  { %s77_s14 = scalar_lea.vmem %s18_s13, 128  ;;  %p82_p1 = scmp.lt.s32.totalorder %s18_s13, %s18_s13 }
   0x3   :  { %p78_p0 = scmp.ne.s32.totalorder %s18_s13, %s77_s14  ;;  %p83_p2 = scmp.lt.s32.totalorder %s77_s14, %s77_s14 }
   0x5   :  { %p84_p3 = por %p83_p2, %p82_p1 }
   0x7   :  { %p85_p4 = pnand %p84_p3, %p78_p0 }
   0x9   :  { %88 = shalt.err (!%p85_p4)
}
   0xa   :  { %20 = dma.hbm_to_vmem [thread:$0]  %s125_s1, 128, %s18_s13, [#allocation3]  }
   0xb   :  { %89 = dma.done.wait [#allocation3], 128  }
   0xc   :  { %90 = vsyncadd [#allocation3], 4294967168  ;;  %v26_v0 = vld [vmem:[%s124_s0] sm:$0xff]  ;;  %vm31_vm0 = vcmask 261120   ;;  %vm59_vm3 = vcmask 7168  }
   0xd   :  { %v27_v1 = vld [vmem:[#allocation2] sm:$0xff] }
   0xe   :  { %v28_v2 = vsub.f32 %v26_v0, %v27_v1  ;;  %v45_v8 = vld [vmem:[%s126_s2] sm:$0xff] }
   0xf   :  { %v46_v12 = vsub.f32 1.0, %v45_v8 }
  0x10   :  { %v29_v3 = vadd.f32 1e-06, %v28_v2 }
  0x12   :  { %v30_v4 = vmul.f32 %v29_v3, %v29_v3 }
  0x14   :  { %v32_v5 = vsel %vm31_vm0, %v30_v4, 0.0 }
  0x15   :  { %33 = vadd.xlane.f32.xlu0 %v32_v5 }
  0x9e   :  { %v34_v6 = vpop.xlane.xlu0 %33 }
  0x9f   :  { %67 = vrsqrt.f32 %v34_v6  ;;  %vm37_vm1 = vcmp.eq.f32.partialorder %v34_v6, inf  ;;  %v40_v10 = vand.u32 2147483648, %v34_v6  ;;  %vm39_vm2 = vcmp.eq.f32.partialorder %v34_v6, 0.0 }
  0xac   :  { %v68_v7 = vpop.eup %67 }
  0xad   :  { %v36_v9 = vmul.f32 %v68_v7, %v34_v6 }
  0xaf   :  { %v38_v11 = vsel %vm37_vm1, %v34_v6, %v36_v9 }
  0xb0   :  { %v41_v13 = vsel %vm39_vm2, %v40_v10, %v38_v11 }
  0xb1   :  { %v42_v14 = vmax.f32 %v41_v13, 0.0  ;;  %v43_v15 = vsub.f32 2.0, %v41_v13 }
  0xb3   :  { %v44_v16 = vmax.f32 %v43_v15, 0.0  ;;  %v47_v17 = vmul.f32 %v46_v12, %v42_v14 }
  0xb5   :  { %v49_v18 = vmul.f32 %v45_v8, %v44_v16  ;;  %v48_v19 = vmul.f32 %v47_v17, %v42_v14 }
  0xb7   :  { %v50_v20 = vmul.f32 %v49_v18, %v44_v16 }
  0xb9   :  { %v51_v21 = vadd.f32 %v50_v20, %v48_v19 }
  0xbb   :  { %60 = vst.msk [vmem:[%s127_s3] sm:$0xff] %vm59_vm3, %v51_v21 }
  0xbc   :  { %65 = vsyncpa [#allocation3], 1 }

</bundles_post_ra>
